<compile_context>
chip_gen: v6e
topology: v6e:2x2x1
jax: 0.10.0
libtpu: 0.0.40
codegen_flags: <defaults>
</compile_context>

<pallas_src>
import functools

import jax
import jax.numpy as jnp
from jax.experimental import pallas as pl
from jax.experimental.pallas import tpu as pltpu

_LANE = 128      # TPU lane width (last-dim vreg width, f32)
_SUBLANE = 8     # TPU sublane count (second-to-last dim, f32)


def _round_up(n, m):
    return (n + m - 1) // m * m


def _mlp_kernel(x_ref, w1_ref, b1_ref, w2_ref, b2_ref, w3_ref, b3_ref, o_ref):
    """Fused MLP forward: (Linear -> ReLU) x 2 -> Linear -> Sigmoid.

    Matmuls run on the MXU with f32 accumulation; ReLU on the VPU and the
    sigmoid's exp on the EUP.  One grid step processes one batch tile; the
    (tiny) weights stay fully resident in VMEM across grid steps via
    constant index maps.  The last weight/bias are pre-padded to 128 output
    lanes so the final store is lane-dense (no masked partial stores).
    """
    x = x_ref[...]                                                  # (TB, D)

    # Hidden layer 1: Linear + ReLU
    h1 = jnp.dot(x, w1_ref[...], preferred_element_type=jnp.float32)
    h1 = jnp.maximum(h1 + b1_ref[...], 0.0)                         # (TB, H0)

    # Hidden layer 2: Linear + ReLU
    h2 = jnp.dot(h1, w2_ref[...], preferred_element_type=jnp.float32)
    h2 = jnp.maximum(h2 + b2_ref[...], 0.0)                         # (TB, H1)

    # Output layer (padded to 128 lanes): Linear + Sigmoid
    z = jnp.dot(h2, w3_ref[...], preferred_element_type=jnp.float32)
    z = z + b3_ref[...]                                             # (TB, 128)
    o_ref[...] = jax.nn.sigmoid(z)


@functools.partial(jax.jit, static_argnames=("batch_tile",))
def binary_classifier_forward(x, params, *, batch_tile=512):
    """Runs the fused MLP Pallas kernel.

    x:      (B, input_size) float32 (any B; padded internally)
    params: dict with w1 (D,H0), b1 (1,H0), w2 (H0,H1), b2 (1,H1),
            w3 (H1,O), b3 (1,O)   -- all float32 (O is typically 1)
    returns (B, O) float32 probabilities
    """
    B, D = x.shape
    H0 = params["w1"].shape[1]
    H1 = params["w2"].shape[1]
    O = params["w3"].shape[1]

    # --- lane-dense output: pad the final layer's output dim to 128 lanes ---
    OP = _round_up(max(O, 1), _LANE)
    w3 = jnp.pad(params["w3"], ((0, 0), (0, OP - O)))
    b3 = jnp.pad(params["b3"], ((0, 0), (0, OP - O)))

    # --- batch tiling: multiple of 8 sublanes, pad B up to a tile multiple ---
    bt = _round_up(min(batch_tile, _round_up(B, _SUBLANE)), _SUBLANE)
    Bp = _round_up(B, bt)
    xp = jnp.pad(x, ((0, Bp - B), (0, 0))) if Bp != B else x

    grid = (Bp // bt,)

    # Weights/biases use full-array blocks with constant index maps (compiler
    # keeps them resident); only the activation/output tiles move with the
    # grid over the batch axis.
    full = lambda shape: pl.BlockSpec(shape, lambda i: (0, 0))

    out = pl.pallas_call(
        _mlp_kernel,
        out_shape=jax.ShapeDtypeStruct((Bp, OP), jnp.float32),
        grid_spec=pltpu.PrefetchScalarGridSpec(
            num_scalar_prefetch=0,
            grid=grid,
            in_specs=[
                pl.BlockSpec((bt, D), lambda i: (i, 0)),   # x tile
                full((D, H0)),                             # w1
                full((1, H0)),                             # b1
                full((H0, H1)),                            # w2
                full((1, H1)),                             # b2
                full((H1, OP)),                            # w3 (lane-padded)
                full((1, OP)),                             # b3 (lane-padded)
            ],
            out_specs=pl.BlockSpec((bt, OP), lambda i: (i, 0)),
        ),
        compiler_params=pltpu.CompilerParams(
            dimension_semantics=("parallel",),
            vmem_limit_bytes=32 * 1024 * 1024,
        ),
    )(xp, params["w1"], params["b1"], params["w2"], params["b2"], w3, b3)

    # Slice away batch padding and the padded output lanes.
    return out[:B, :O]


def init_params(key, input_size, hidden_layers, output_size=1):
    """Deterministic PyTorch-style init: U(-1/sqrt(fan_in), 1/sqrt(fan_in)).

    Weights are stored transposed relative to nn.Linear, i.e. (in, out).
    """
    dims = [input_size] + list(hidden_layers) + [output_size]
    params = {}
    for idx in range(len(dims) - 1):
        fan_in, fan_out = dims[idx], dims[idx + 1]
        key, kw, kb = jax.random.split(key, 3)
        bound = 1.0 / jnp.sqrt(jnp.float32(fan_in))
        params[f"w{idx + 1}"] = jax.random.uniform(
            kw, (fan_in, fan_out), jnp.float32, -bound, bound)
        params[f"b{idx + 1}"] = jax.random.uniform(
            kb, (1, fan_out), jnp.float32, -bound, bound)
    return params


def reference_forward(x, params):
    """Pure-JAX reference for correctness checking."""
    h = jnp.maximum(x @ params["w1"] + params["b1"], 0.0)
    h = jnp.maximum(h @ params["w2"] + params["b2"], 0.0)
    z = h @ params["w3"] + params["b3"]
    return jax.nn.sigmoid(z)


if __name__ == "__main__":
    key = jax.random.PRNGKey(0)
    key, kx, kx2 = jax.random.split(key, 3)

    # Small shapes consistent with the module: batch=8, input=16, hidden=[32, 32]
    B, D = 8, 16
    hidden_layers = [32, 32]

    params = init_params(key, D, hidden_layers, output_size=1)

    x = jax.random.normal(kx, (B, D), jnp.float32)
    out = binary_classifier_forward(x, params)
    out = jax.block_until_ready(out)
    ref = reference_forward(x, params)
    assert out.shape == (B, 1)
    assert jnp.allclose(out, ref, atol=1e-5, rtol=1e-5), "mismatch vs reference"

    # Second (still small) check: non-tile-divisible batch exercises the
    # padding / multi-tile grid path.
    B2 = 200
    x2 = jax.random.normal(kx2, (B2, D), jnp.float32)
    out2 = jax.block_until_ready(
        binary_classifier_forward(x2, params, batch_tile=64))
    ref2 = reference_forward(x2, params)
    assert out2.shape == (B2, 1)
    assert jnp.allclose(out2, ref2, atol=1e-5, rtol=1e-5), "mismatch (tiled path)"

    print("KERNEL_OK")
</pallas_src>

<mosaic_0001>
module attributes {stable_mosaic.version = 11 : i64} {
  func.func @_mlp_kernel(%arg0: i32, %arg1: memref<8x16xf32, #tpu.memory_space<vmem>>, %arg2: memref<16x32xf32, #tpu.memory_space<vmem>>, %arg3: memref<1x32xf32, #tpu.memory_space<vmem>>, %arg4: memref<32x32xf32, #tpu.memory_space<vmem>>, %arg5: memref<1x32xf32, #tpu.memory_space<vmem>>, %arg6: memref<32x128xf32, #tpu.memory_space<vmem>>, %arg7: memref<1x128xf32, #tpu.memory_space<vmem>>, %arg8: memref<8x128xf32, #tpu.memory_space<vmem>>) attributes {dimension_semantics = [#tpu.dimension_semantics<parallel>], iteration_bounds = array<i64: 1>, scalar_prefetch = 0 : i64, scratch_operands = 0 : i64, tpu.core_type = #tpu.core_type<tc>, window_params = [{transform_indices = @transform_0, window_bounds = array<i64: 8, 16>}, {pipeline_mode = #tpu.pipeline_mode<synchronous>, transform_indices = @transform_1, window_bounds = array<i64: 16, 32>}, {pipeline_mode = #tpu.pipeline_mode<synchronous>, transform_indices = @transform_2, window_bounds = array<i64: 1, 32>}, {pipeline_mode = #tpu.pipeline_mode<synchronous>, transform_indices = @transform_3, window_bounds = array<i64: 32, 32>}, {pipeline_mode = #tpu.pipeline_mode<synchronous>, transform_indices = @transform_4, window_bounds = array<i64: 1, 32>}, {pipeline_mode = #tpu.pipeline_mode<synchronous>, transform_indices = @transform_5, window_bounds = array<i64: 32, 128>}, {pipeline_mode = #tpu.pipeline_mode<synchronous>, transform_indices = @transform_6, window_bounds = array<i64: 1, 128>}, {transform_indices = @transform_7, window_bounds = array<i64: 8, 128>}]} {
    %c0 = arith.constant 0 : index
    %c0_0 = arith.constant 0 : index
    %0 = vector.load %arg1[%c0, %c0_0] : memref<8x16xf32, #tpu.memory_space<vmem>>, vector<8x16xf32>
    %c0_1 = arith.constant 0 : index
    %c0_2 = arith.constant 0 : index
    %1 = vector.load %arg2[%c0_1, %c0_2] : memref<16x32xf32, #tpu.memory_space<vmem>>, vector<16x32xf32>
    %cst = arith.constant dense<0.000000e+00> : vector<8x32xf32>
    %2 = tpu.matmul %0, %1, %cst {dimension_numbers = #tpu.dot_dimension_numbers<[1], [0], [0], [1], [0, 0, 1, 1], [], []>} : vector<8x16xf32>, vector<16x32xf32>, vector<8x32xf32> -> vector<8x32xf32>
    %c0_3 = arith.constant 0 : index
    %c0_4 = arith.constant 0 : index
    %3 = vector.load %arg3[%c0_3, %c0_4] : memref<1x32xf32, #tpu.memory_space<vmem>>, vector<1x32xf32>
    %4 = vector.broadcast %3 : vector<1x32xf32> to vector<8x32xf32>
    %5 = arith.addf %2, %4 : vector<8x32xf32>
    %cst_5 = arith.constant 0.000000e+00 : f32
    %6 = vector.broadcast %cst_5 : f32 to vector<8x32xf32>
    %7 = arith.maximumf %5, %6 : vector<8x32xf32>
    %c0_6 = arith.constant 0 : index
    %c0_7 = arith.constant 0 : index
    %8 = vector.load %arg4[%c0_6, %c0_7] : memref<32x32xf32, #tpu.memory_space<vmem>>, vector<32x32xf32>
    %cst_8 = arith.constant dense<0.000000e+00> : vector<8x32xf32>
    %9 = tpu.matmul %7, %8, %cst_8 {dimension_numbers = #tpu.dot_dimension_numbers<[1], [0], [0], [1], [0, 0, 1, 1], [], []>} : vector<8x32xf32>, vector<32x32xf32>, vector<8x32xf32> -> vector<8x32xf32>
    %c0_9 = arith.constant 0 : index
    %c0_10 = arith.constant 0 : index
    %10 = vector.load %arg5[%c0_9, %c0_10] : memref<1x32xf32, #tpu.memory_space<vmem>>, vector<1x32xf32>
    %11 = vector.broadcast %10 : vector<1x32xf32> to vector<8x32xf32>
    %12 = arith.addf %9, %11 : vector<8x32xf32>
    %cst_11 = arith.constant 0.000000e+00 : f32
    %13 = vector.broadcast %cst_11 : f32 to vector<8x32xf32>
    %14 = arith.maximumf %12, %13 : vector<8x32xf32>
    %c0_12 = arith.constant 0 : index
    %c0_13 = arith.constant 0 : index
    %15 = vector.load %arg6[%c0_12, %c0_13] : memref<32x128xf32, #tpu.memory_space<vmem>>, vector<32x128xf32>
    %cst_14 = arith.constant dense<0.000000e+00> : vector<8x128xf32>
    %16 = tpu.matmul %14, %15, %cst_14 {dimension_numbers = #tpu.dot_dimension_numbers<[1], [0], [0], [1], [0, 0, 1, 1], [], []>} : vector<8x32xf32>, vector<32x128xf32>, vector<8x128xf32> -> vector<8x128xf32>
    %c0_15 = arith.constant 0 : index
    %c0_16 = arith.constant 0 : index
    %17 = vector.load %arg7[%c0_15, %c0_16] : memref<1x128xf32, #tpu.memory_space<vmem>>, vector<1x128xf32>
    %18 = vector.broadcast %17 : vector<1x128xf32> to vector<8x128xf32>
    %19 = arith.addf %16, %18 : vector<8x128xf32>
    %20 = arith.negf %19 : vector<8x128xf32>
    %21 = math.exp %20 : vector<8x128xf32>
    %cst_17 = arith.constant 1.000000e+00 : f32
    %22 = vector.broadcast %cst_17 : f32 to vector<8x128xf32>
    %23 = arith.addf %22, %21 : vector<8x128xf32>
    %24 = arith.divf %22, %23 : vector<8x128xf32>
    %c0_18 = arith.constant 0 : index
    %c0_19 = arith.constant 0 : index
    %25 = vector.load %arg8[%c0_18, %c0_19] : memref<8x128xf32, #tpu.memory_space<vmem>>, vector<8x128xf32>
    tpu.vector_store %arg8[%c0_18, %c0_19], %24 {strides = array<i32>} : memref<8x128xf32, #tpu.memory_space<vmem>>, vector<8x128xf32>,
    return
  }
  func.func @transform_0(%arg0: i32) -> (i32, i32) {
    %c0_i32 = arith.constant 0 : i32
    %c0_i32_0 = arith.constant 0 : i32
    return %arg0, %c0_i32 : i32, i32
  }
  func.func @transform_1(%arg0: i32) -> (i32, i32) {
    %c0_i32 = arith.constant 0 : i32
    %c0_i32_0 = arith.constant 0 : i32
    %c0_i32_1 = arith.constant 0 : i32
    return %c0_i32, %c0_i32_0 : i32, i32
  }
  func.func @transform_2(%arg0: i32) -> (i32, i32) {
    %c0_i32 = arith.constant 0 : i32
    %c0_i32_0 = arith.constant 0 : i32
    %c0_i32_1 = arith.constant 0 : i32
    return %c0_i32, %c0_i32_0 : i32, i32
  }
  func.func @transform_3(%arg0: i32) -> (i32, i32) {
    %c0_i32 = arith.constant 0 : i32
    %c0_i32_0 = arith.constant 0 : i32
    %c0_i32_1 = arith.constant 0 : i32
    return %c0_i32, %c0_i32_0 : i32, i32
  }
  func.func @transform_4(%arg0: i32) -> (i32, i32) {
    %c0_i32 = arith.constant 0 : i32
    %c0_i32_0 = arith.constant 0 : i32
    %c0_i32_1 = arith.constant 0 : i32
    return %c0_i32, %c0_i32_0 : i32, i32
  }
  func.func @transform_5(%arg0: i32) -> (i32, i32) {
    %c0_i32 = arith.constant 0 : i32
    %c0_i32_0 = arith.constant 0 : i32
    %c0_i32_1 = arith.constant 0 : i32
    return %c0_i32, %c0_i32_0 : i32, i32
  }
  func.func @transform_6(%arg0: i32) -> (i32, i32) {
    %c0_i32 = arith.constant 0 : i32
    %c0_i32_0 = arith.constant 0 : i32
    %c0_i32_1 = arith.constant 0 : i32
    return %c0_i32, %c0_i32_0 : i32, i32
  }
  func.func @transform_7(%arg0: i32) -> (i32, i32) {
    %c0_i32 = arith.constant 0 : i32
    %c0_i32_0 = arith.constant 0 : i32
    return %arg0, %c0_i32 : i32, i32
  }
}

</mosaic_0001>

<bundles_post_ra>
// kernel: binary_classifier_forward.1
= control target key start
LH: loop header
LB: loop body
LE: loop exit
PB: predicated region body
PF: predicated region fallthrough
CT: control target
= control target key end

     0   :  { %v347_v0 = vmov 0.0   ;;  %vm348_vm0 = vmmov 0   ;;  %vm36_vm1 = vcmask 130048   ;;  %vm122_vm2 = vcmask 261120   ;;  %s436_s1 = inlined_call_operand.vmem [shape: f32[16,32], index: 1, kind: input, shape index: {}]   ;;  %s437_s0 = inlined_call_operand.vmem [shape: f32[8,16], index: 0, kind: input, shape index: {}]   ;;  %s438_s3 = inlined_call_operand.vmem [shape: f32[32,32], index: 3, kind: input, shape index: {}]   ;;  %s439_s5 = inlined_call_operand.vmem [shape: f32[32,128], index: 5, kind: input, shape index: {}]   ;;  %s440_s2 = inlined_call_operand.vmem [shape: f32[1,32], index: 2, kind: input, shape index: {}]   ;;  %s441_s4 = inlined_call_operand.vmem [shape: f32[1,32], index: 4, kind: input, shape index: {}]   ;;  %s442_s6 = inlined_call_operand.vmem [shape: f32[1,128], index: 6, kind: input, shape index: {}]   ;;  %s443_s7 = inlined_call_operand.vmem [shape: f32[8,128], index: 7, kind: output, shape index: {}]  }
   0x1   :  { %312 = vmatprep.subr.mxu0 %v347_v0  ;;  %v28_v1 = vld [vmem:[%s436_s1 + $0x8] sm:$0xff]  ;;  %v27_v2 = vld [vmem:[%s436_s1] sm:$0xff]  ;;  %316 = vmatprep.mubr.msk.f32.mxu0 %vm348_vm0, %v347_v0  ;;  %v114_v4 = vld [vmem:[%s438_s3 + $0x18] sm:$0xff] }
   0x2   :  { %313 = vmatpush3.msra.mxu0 %v28_v1  ;;  %v26_v3 = vld [vmem:[%s437_s0] sm:$0xff]  ;;  %319 = vmatprep.subr.mxu1 %v347_v0  ;;  %v113_v5 = vld [vmem:[%s438_s3 + $0x10] sm:$0xff]  ;;  %v112_v6 = vld [vmem:[%s438_s3 + $0x8] sm:$0xff] }
   0x3   :  { %314 = vmatprep.subr.mxu0 %v347_v0  ;;  %320 = vmatpush3.msra.mxu1 %v114_v4  ;;  %v111_v7 = vld [vmem:[%s438_s3] sm:$0xff]  ;;  %v200_v8 = vld [vmem:[%s439_s5 + $0x18] sm:$0xff]  ;;  %v199_v14 = vld [vmem:[%s439_s5 + $0x10] sm:$0xff] }
   0x4   :  { %315 = vmatpush3.msra.mxu0 %v27_v2  ;;  %321 = vmatprep.subr.mxu1 %v347_v0  ;;  %v292_v9 = vld [vmem:[%s440_s2] ss:$0 sm:$0xff]  ;;  %v198_v15 = vld [vmem:[%s439_s5 + $0x8] sm:$0xff] }
   0x5   :  { %317 = vmatmul.mubr.msk.f32.vlgmr.msra.gmra.mxu0 %vm36_vm1, %v26_v3  ;;  %327 = vmatprep.mubr.msk.f32.mxu1 %vm348_vm0, %v347_v0  ;;  %v197_v16 = vld [vmem:[%s439_s5] sm:$0xff] }
   0x6   :  { %330 = vmatprep.subr.mxu0 %v347_v0  ;;  %338 = vmatprep.mubr.msk.f32.mxu0 %vm348_vm0, %v347_v0  ;;  %v294_v17 = vld [vmem:[%s441_s4] ss:$0 sm:$0xff] }
   0x7   :  { %322 = vmatpush3.msra.mxu1 %v113_v5  ;;  %331 = vmatpush3.msra.mxu0 %v200_v8  ;;  %v296_v22 = vld [vmem:[%s442_s6] ss:$0 sm:$0xff] }
   0x8   :  { %323 = vmatprep.subr.mxu1 %v347_v0  ;;  %332 = vmatprep.subr.mxu0 %v347_v0 }
   0x9   :  { %324 = vmatpush3.msra.mxu1 %v112_v6  ;;  %333 = vmatpush3.msra.mxu0 %v199_v14 }
   0xa   :  { %325 = vmatprep.subr.mxu1 %v347_v0  ;;  %334 = vmatprep.subr.mxu0 %v347_v0 }
   0xb   :  { %326 = vmatpush3.msra.mxu1 %v111_v7  ;;  %335 = vmatpush3.msra.mxu0 %v198_v15 }
   0xc   :  { %336 = vmatprep.subr.mxu0 %v347_v0 }
   0xd   :  { %337 = vmatpush3.msra.mxu0 %v197_v16 }
  0xc5   :  { %v106_v10 = vpop.f32.mrf.mxu0 }
  0xc6   :  { %v107_v11 = vadd.f32 %v292_v9, %v106_v10 }
  0xc7   :  { %v318_v12 = vpop.f32.mrf.mxu0 }
  0xc8   :  { %v110_v13 = vmax.f32 %v107_v11, 0.0 }
  0xca   :  { %328 = vmatmul.mubr.msk.f32.vlgmr.msra.gmra.mxu1 %vm122_vm2, %v110_v13 }
 0x18a   :  { %v192_v18 = vpop.f32.mrf.mxu1 }
 0x18b   :  { %v193_v19 = vadd.f32 %v294_v17, %v192_v18 }
 0x18c   :  { %v329_v20 = vpop.f32.mrf.mxu1 }
 0x18d   :  { %v196_v21 = vmax.f32 %v193_v19, 0.0 }
 0x18f   :  { %339 = vmatmul.mubr.msk.f32.vlgmr.msra.gmra.mxu0 %vm122_vm2, %v196_v21 }
 0x24f   :  { %v277_v23 = vpop.f32.mrf.mxu0 }
 0x250   :  { %v278_v24 = vadd.f32 %v296_v22, %v277_v23 }
 0x251   :  { %v340_v25 = vpop.f32.mrf.mxu0 }
 0x252   :  { %v298_v26 = vmul.f32 -1.442695, %v278_v24 }
 0x254   :  { %343 = vpow2.f32 %v298_v26 }
 0x261   :  { %v344_v27 = vpop.eup %343 }
 0x262   :  { %v284_v28 = vadd.f32 1.0, %v344_v27 }
 0x264   :  { %345 = vrcp.f32 %v284_v28 }
 0x271   :  { %v346_v29 = vpop.eup %345 }
 0x272   :  { %287 = vst [vmem:[%s443_s7] sm:$0xff] %v346_v29 }

</bundles_post_ra>
